<compile_context>
chip_gen: v7x
topology: tpu7x:2x2x1
jax: 0.10.0
libtpu: 0.0.40
codegen_flags: <defaults>
</compile_context>

<pallas_src>
import functools

import jax
import jax.numpy as jnp
from jax.experimental import pallas as pl
from jax.experimental.pallas import tpu as pltpu

LANES = 128          # lane padding *inside* the packed-params buffer only
PARAM_ROWS = 24      # rows 0..15: weight rows (max fan_in = 16); row 16: bias; rest pad
BIAS_ROW = 16
LAYER_DIMS = ((4, 16), (16, 8), (8, 3))   # (fan_in, fan_out); last layer has no ReLU


def _round_up(n, m):
    return ((n + m - 1) // m) * m


def _iris_kernel(params_ref, x_ref, o_ref, *, layer_dims):
    """One batch-tile of the MLP forward, entirely on the VPU.

    x_ref:      (tile_b, in_dim)   compact input block
    params_ref: (n_layers, 24, 128) zero-padded weights+biases (VMEM-resident)
    o_ref:      (tile_b, out_dim)  compact logits block
    Hidden activations live only in-register as lane-padded [tile_b, 128]
    values; padded lanes stay exactly zero since the padded weights/biases
    are zero and ReLU(0) == 0.
    """
    tile_b = x_ref.shape[0]
    out_dim = o_ref.shape[1]
    n_layers = len(layer_dims)

    act = x_ref[...]                                             # [tile_b, in_dim]
    for l, (fan_in, _fan_out) in enumerate(layer_dims):
        layer = params_ref[l]                                    # [24, 128]
        # Start the accumulator from the (lane-padded) bias row.
        acc = jnp.broadcast_to(layer[BIAS_ROW:BIAS_ROW + 1, :], (tile_b, LANES))
        # Unrolled broadcast-multiply-accumulate over the tiny K dimension.
        for k in range(fan_in):
            acc = acc + act[:, k:k + 1] * layer[k:k + 1, :]
        act = jnp.maximum(acc, 0.0) if l < n_layers - 1 else acc
    o_ref[...] = act[:, :out_dim]                                # narrow (masked) store


def iris_forward(x, packed_params, *, layer_dims=LAYER_DIMS, tile_b=2048):
    """x: [B, input_dim] float32 -> [B, output_dim] float32 logits."""
    B, in_dim = x.shape
    assert in_dim == layer_dims[0][0]
    out_dim = layer_dims[-1][1]

    # --- batch-tile sizing -------------------------------------------------
    tile_b = max(8, (int(tile_b) // 8) * 8)          # sublane multiple (correctness)
    tile_b = min(tile_b, 4096)                       # VMEM headroom on v5e/v7x scoped defaults
    # Guarantee >= 2 grid steps when possible so "parallel" uses both v7x TCs.
    tile_b = min(tile_b, max(8, _round_up((B + 1) // 2, 8)))

    # Only the batch dim is ever padded, and only when it does not divide.
    b_pad = _round_up(B, tile_b)
    x_in = x if b_pad == B else jnp.pad(x, ((0, b_pad - B), (0, 0)))

    grid = (b_pad // tile_b,)
    kernel = functools.partial(_iris_kernel, layer_dims=layer_dims)

    out = pl.pallas_call(
        kernel,
        out_shape=jax.ShapeDtypeStruct((b_pad, out_dim), jnp.float32),
        grid=grid,
        in_specs=[
            # Single packed parameter buffer: constant index_map -> loaded once,
            # stays VMEM-resident across all batch tiles (36 KiB).
            pl.BlockSpec((len(layer_dims), PARAM_ROWS, LANES), lambda i: (0, 0, 0)),
            # Compact input block: last dim == full array dim (no 128 padding).
            pl.BlockSpec((tile_b, in_dim), lambda i: (i, 0)),
        ],
        # Compact output block: last dim == full array dim.
        out_specs=pl.BlockSpec((tile_b, out_dim), lambda i: (i, 0)),
        compiler_params=pltpu.CompilerParams(
            dimension_semantics=("parallel",),   # shard batch tiles across TCs on v7x
        ),
    )(packed_params, x_in)

    return out if b_pad == B else out[:B]


def init_params(key, input_dim, output_dim):
    """Deterministic init mimicking nn.Linear defaults (uniform +-1/sqrt(fan_in)).

    Returns a list of (w [in, out], b [out]) per layer, i.e. y = x @ w + b
    (equivalent to PyTorch's x @ W.T + b with W of shape [out, in]).
    """
    dims = [(input_dim, 16), (16, 8), (8, output_dim)]
    params = []
    for fan_in, fan_out in dims:
        key, kw, kb = jax.random.split(key, 3)
        bound = 1.0 / jnp.sqrt(jnp.float32(fan_in))
        w = jax.random.uniform(kw, (fan_in, fan_out), jnp.float32, -bound, bound)
        b = jax.random.uniform(kb, (fan_out,), jnp.float32, -bound, bound)
        params.append((w, b))
    return params


def pack_params(params, layer_dims=LAYER_DIMS):
    """Pack all weights/biases into one zero-padded [n_layers, 24, 128] buffer."""
    packed = jnp.zeros((len(layer_dims), PARAM_ROWS, LANES), jnp.float32)
    for l, (w, b) in enumerate(params):
        fi, fo = w.shape
        packed = packed.at[l, :fi, :fo].set(w)
        packed = packed.at[l, BIAS_ROW, :fo].set(b)
    return packed


def reference_forward(x, params):
    """Plain-JAX reference for sanity checking."""
    (w1, b1), (w2, b2), (w3, b3) = params
    h1 = jnp.maximum(x @ w1 + b1, 0.0)
    h2 = jnp.maximum(h1 @ w2 + b2, 0.0)
    return h2 @ w3 + b3


if __name__ == "__main__":
    input_dim, output_dim = 4, 3

    key = jax.random.PRNGKey(0)
    key, kx1, kx2 = jax.random.split(key, 3)
    params = init_params(key, input_dim, output_dim)
    packed = pack_params(params)

    # Case 1: batch divides the tile -> zero wrapper copies, 2 grid steps.
    x1 = jax.random.normal(kx1, (32, input_dim), jnp.float32)
    out1 = iris_forward(x1, packed)
    jax.block_until_ready(out1)
    ref1 = reference_forward(x1, params)
    assert out1.shape == (32, output_dim)
    assert jnp.allclose(out1, ref1, atol=1e-5, rtol=1e-5)

    # Case 2: ragged batch -> batch-dim-only pad path.
    x2 = jax.random.normal(kx2, (37, input_dim), jnp.float32)
    out2 = iris_forward(x2, packed)
    jax.block_until_ready(out2)
    ref2 = reference_forward(x2, params)
    assert out2.shape == (37, output_dim)
    assert jnp.allclose(out2, ref2, atol=1e-5, rtol=1e-5)

    print("KERNEL_OK")
</pallas_src>

<mosaic_0001>
module attributes {stable_mosaic.version = 11 : i64} {
  func.func @_iris_kernel(%arg0: i32, %arg1: memref<3x24x128xf32, #tpu.memory_space<vmem>>, %arg2: memref<16x4xf32, #tpu.memory_space<vmem>>, %arg3: memref<16x3xf32, #tpu.memory_space<vmem>>) attributes {dimension_semantics = [#tpu.dimension_semantics<parallel>], iteration_bounds = array<i64: 2>, scalar_prefetch = 0 : i64, scratch_operands = 0 : i64, tpu.core_type = #tpu.core_type<tc>, window_params = [{pipeline_mode = #tpu.pipeline_mode<synchronous>, transform_indices = @transform_0, window_bounds = array<i64: 3, 24, 128>}, {transform_indices = @transform_1, window_bounds = array<i64: 16, 4>}, {transform_indices = @transform_2, window_bounds = array<i64: 16, 3>}]} {
    %c0 = arith.constant 0 : index
    %c0_0 = arith.constant 0 : index
    %0 = vector.load %arg2[%c0, %c0_0] : memref<16x4xf32, #tpu.memory_space<vmem>>, vector<16x4xf32>
    %c0_1 = arith.constant 0 : index
    %c0_2 = arith.constant 0 : index
    %c0_3 = arith.constant 0 : index
    %1 = vector.load %arg1[%c0_1, %c0_2, %c0_3] : memref<3x24x128xf32, #tpu.memory_space<vmem>>, vector<1x24x128xf32>
    %2 = vector.shape_cast %1 : vector<1x24x128xf32> to vector<24x128xf32>
    %3 = vector.extract_strided_slice %2 {offsets = [16, 0], sizes = [1, 128], strides = [1, 1]} : vector<24x128xf32> to vector<1x128xf32>
    %4 = vector.shape_cast %3 : vector<1x128xf32> to vector<1x128xf32>
    %5 = vector.broadcast %4 : vector<1x128xf32> to vector<16x128xf32>
    %6 = vector.extract_strided_slice %0 {offsets = [0, 0], sizes = [16, 1], strides = [1, 1]} : vector<16x4xf32> to vector<16x1xf32>
    %7 = vector.extract_strided_slice %2 {offsets = [0, 0], sizes = [1, 128], strides = [1, 1]} : vector<24x128xf32> to vector<1x128xf32>
    %8 = vector.broadcast %6 : vector<16x1xf32> to vector<16x128xf32>
    %9 = vector.broadcast %7 : vector<1x128xf32> to vector<16x128xf32>
    %10 = arith.mulf %8, %9 : vector<16x128xf32>
    %11 = arith.addf %5, %10 : vector<16x128xf32>
    %12 = vector.extract_strided_slice %0 {offsets = [0, 1], sizes = [16, 1], strides = [1, 1]} : vector<16x4xf32> to vector<16x1xf32>
    %13 = vector.extract_strided_slice %2 {offsets = [1, 0], sizes = [1, 128], strides = [1, 1]} : vector<24x128xf32> to vector<1x128xf32>
    %14 = vector.broadcast %12 : vector<16x1xf32> to vector<16x128xf32>
    %15 = vector.broadcast %13 : vector<1x128xf32> to vector<16x128xf32>
    %16 = arith.mulf %14, %15 : vector<16x128xf32>
    %17 = arith.addf %11, %16 : vector<16x128xf32>
    %18 = vector.extract_strided_slice %0 {offsets = [0, 2], sizes = [16, 1], strides = [1, 1]} : vector<16x4xf32> to vector<16x1xf32>
    %19 = vector.extract_strided_slice %2 {offsets = [2, 0], sizes = [1, 128], strides = [1, 1]} : vector<24x128xf32> to vector<1x128xf32>
    %20 = vector.broadcast %18 : vector<16x1xf32> to vector<16x128xf32>
    %21 = vector.broadcast %19 : vector<1x128xf32> to vector<16x128xf32>
    %22 = arith.mulf %20, %21 : vector<16x128xf32>
    %23 = arith.addf %17, %22 : vector<16x128xf32>
    %24 = vector.extract_strided_slice %0 {offsets = [0, 3], sizes = [16, 1], strides = [1, 1]} : vector<16x4xf32> to vector<16x1xf32>
    %25 = vector.extract_strided_slice %2 {offsets = [3, 0], sizes = [1, 128], strides = [1, 1]} : vector<24x128xf32> to vector<1x128xf32>
    %26 = vector.broadcast %24 : vector<16x1xf32> to vector<16x128xf32>
    %27 = vector.broadcast %25 : vector<1x128xf32> to vector<16x128xf32>
    %28 = arith.mulf %26, %27 : vector<16x128xf32>
    %29 = arith.addf %23, %28 : vector<16x128xf32>
    %cst = arith.constant 0.000000e+00 : f32
    %30 = vector.broadcast %cst : f32 to vector<16x128xf32>
    %31 = arith.maximumf %29, %30 : vector<16x128xf32>
    %c1 = arith.constant 1 : index
    %c0_4 = arith.constant 0 : index
    %c0_5 = arith.constant 0 : index
    %32 = vector.load %arg1[%c1, %c0_4, %c0_5] : memref<3x24x128xf32, #tpu.memory_space<vmem>>, vector<1x24x128xf32>
    %33 = vector.shape_cast %32 : vector<1x24x128xf32> to vector<24x128xf32>
    %34 = vector.extract_strided_slice %33 {offsets = [16, 0], sizes = [1, 128], strides = [1, 1]} : vector<24x128xf32> to vector<1x128xf32>
    %35 = vector.shape_cast %34 : vector<1x128xf32> to vector<1x128xf32>
    %36 = vector.broadcast %35 : vector<1x128xf32> to vector<16x128xf32>
    %37 = vector.extract_strided_slice %31 {offsets = [0, 0], sizes = [16, 1], strides = [1, 1]} : vector<16x128xf32> to vector<16x1xf32>
    %38 = vector.extract_strided_slice %33 {offsets = [0, 0], sizes = [1, 128], strides = [1, 1]} : vector<24x128xf32> to vector<1x128xf32>
    %39 = vector.broadcast %37 : vector<16x1xf32> to vector<16x128xf32>
    %40 = vector.broadcast %38 : vector<1x128xf32> to vector<16x128xf32>
    %41 = arith.mulf %39, %40 : vector<16x128xf32>
    %42 = arith.addf %36, %41 : vector<16x128xf32>
    %43 = vector.extract_strided_slice %31 {offsets = [0, 1], sizes = [16, 1], strides = [1, 1]} : vector<16x128xf32> to vector<16x1xf32>
    %44 = vector.extract_strided_slice %33 {offsets = [1, 0], sizes = [1, 128], strides = [1, 1]} : vector<24x128xf32> to vector<1x128xf32>
    %45 = vector.broadcast %43 : vector<16x1xf32> to vector<16x128xf32>
    %46 = vector.broadcast %44 : vector<1x128xf32> to vector<16x128xf32>
    %47 = arith.mulf %45, %46 : vector<16x128xf32>
    %48 = arith.addf %42, %47 : vector<16x128xf32>
    %49 = vector.extract_strided_slice %31 {offsets = [0, 2], sizes = [16, 1], strides = [1, 1]} : vector<16x128xf32> to vector<16x1xf32>
    %50 = vector.extract_strided_slice %33 {offsets = [2, 0], sizes = [1, 128], strides = [1, 1]} : vector<24x128xf32> to vector<1x128xf32>
    %51 = vector.broadcast %49 : vector<16x1xf32> to vector<16x128xf32>
    %52 = vector.broadcast %50 : vector<1x128xf32> to vector<16x128xf32>
    %53 = arith.mulf %51, %52 : vector<16x128xf32>
    %54 = arith.addf %48, %53 : vector<16x128xf32>
    %55 = vector.extract_strided_slice %31 {offsets = [0, 3], sizes = [16, 1], strides = [1, 1]} : vector<16x128xf32> to vector<16x1xf32>
    %56 = vector.extract_strided_slice %33 {offsets = [3, 0], sizes = [1, 128], strides = [1, 1]} : vector<24x128xf32> to vector<1x128xf32>
    %57 = vector.broadcast %55 : vector<16x1xf32> to vector<16x128xf32>
    %58 = vector.broadcast %56 : vector<1x128xf32> to vector<16x128xf32>
    %59 = arith.mulf %57, %58 : vector<16x128xf32>
    %60 = arith.addf %54, %59 : vector<16x128xf32>
    %61 = vector.extract_strided_slice %31 {offsets = [0, 4], sizes = [16, 1], strides = [1, 1]} : vector<16x128xf32> to vector<16x1xf32>
    %62 = vector.extract_strided_slice %33 {offsets = [4, 0], sizes = [1, 128], strides = [1, 1]} : vector<24x128xf32> to vector<1x128xf32>
    %63 = vector.broadcast %61 : vector<16x1xf32> to vector<16x128xf32>
    %64 = vector.broadcast %62 : vector<1x128xf32> to vector<16x128xf32>
    %65 = arith.mulf %63, %64 : vector<16x128xf32>
    %66 = arith.addf %60, %65 : vector<16x128xf32>
    %67 = vector.extract_strided_slice %31 {offsets = [0, 5], sizes = [16, 1], strides = [1, 1]} : vector<16x128xf32> to vector<16x1xf32>
    %68 = vector.extract_strided_slice %33 {offsets = [5, 0], sizes = [1, 128], strides = [1, 1]} : vector<24x128xf32> to vector<1x128xf32>
    %69 = vector.broadcast %67 : vector<16x1xf32> to vector<16x128xf32>
    %70 = vector.broadcast %68 : vector<1x128xf32> to vector<16x128xf32>
    %71 = arith.mulf %69, %70 : vector<16x128xf32>
    %72 = arith.addf %66, %71 : vector<16x128xf32>
    %73 = vector.extract_strided_slice %31 {offsets = [0, 6], sizes = [16, 1], strides = [1, 1]} : vector<16x128xf32> to vector<16x1xf32>
    %74 = vector.extract_strided_slice %33 {offsets = [6, 0], sizes = [1, 128], strides = [1, 1]} : vector<24x128xf32> to vector<1x128xf32>
    %75 = vector.broadcast %73 : vector<16x1xf32> to vector<16x128xf32>
    %76 = vector.broadcast %74 : vector<1x128xf32> to vector<16x128xf32>
    %77 = arith.mulf %75, %76 : vector<16x128xf32>
    %78 = arith.addf %72, %77 : vector<16x128xf32>
    %79 = vector.extract_strided_slice %31 {offsets = [0, 7], sizes = [16, 1], strides = [1, 1]} : vector<16x128xf32> to vector<16x1xf32>
    %80 = vector.extract_strided_slice %33 {offsets = [7, 0], sizes = [1, 128], strides = [1, 1]} : vector<24x128xf32> to vector<1x128xf32>
    %81 = vector.broadcast %79 : vector<16x1xf32> to vector<16x128xf32>
    %82 = vector.broadcast %80 : vector<1x128xf32> to vector<16x128xf32>
    %83 = arith.mulf %81, %82 : vector<16x128xf32>
    %84 = arith.addf %78, %83 : vector<16x128xf32>
    %85 = vector.extract_strided_slice %31 {offsets = [0, 8], sizes = [16, 1], strides = [1, 1]} : vector<16x128xf32> to vector<16x1xf32>
    %86 = vector.extract_strided_slice %33 {offsets = [8, 0], sizes = [1, 128], strides = [1, 1]} : vector<24x128xf32> to vector<1x128xf32>
    %87 = vector.broadcast %85 : vector<16x1xf32> to vector<16x128xf32>
    %88 = vector.broadcast %86 : vector<1x128xf32> to vector<16x128xf32>
    %89 = arith.mulf %87, %88 : vector<16x128xf32>
    %90 = arith.addf %84, %89 : vector<16x128xf32>
    %91 = vector.extract_strided_slice %31 {offsets = [0, 9], sizes = [16, 1], strides = [1, 1]} : vector<16x128xf32> to vector<16x1xf32>
    %92 = vector.extract_strided_slice %33 {offsets = [9, 0], sizes = [1, 128], strides = [1, 1]} : vector<24x128xf32> to vector<1x128xf32>
    %93 = vector.broadcast %91 : vector<16x1xf32> to vector<16x128xf32>
    %94 = vector.broadcast %92 : vector<1x128xf32> to vector<16x128xf32>
    %95 = arith.mulf %93, %94 : vector<16x128xf32>
    %96 = arith.addf %90, %95 : vector<16x128xf32>
    %97 = vector.extract_strided_slice %31 {offsets = [0, 10], sizes = [16, 1], strides = [1, 1]} : vector<16x128xf32> to vector<16x1xf32>
    %98 = vector.extract_strided_slice %33 {offsets = [10, 0], sizes = [1, 128], strides = [1, 1]} : vector<24x128xf32> to vector<1x128xf32>
    %99 = vector.broadcast %97 : vector<16x1xf32> to vector<16x128xf32>
    %100 = vector.broadcast %98 : vector<1x128xf32> to vector<16x128xf32>
    %101 = arith.mulf %99, %100 : vector<16x128xf32>
    %102 = arith.addf %96, %101 : vector<16x128xf32>
    %103 = vector.extract_strided_slice %31 {offsets = [0, 11], sizes = [16, 1], strides = [1, 1]} : vector<16x128xf32> to vector<16x1xf32>
    %104 = vector.extract_strided_slice %33 {offsets = [11, 0], sizes = [1, 128], strides = [1, 1]} : vector<24x128xf32> to vector<1x128xf32>
    %105 = vector.broadcast %103 : vector<16x1xf32> to vector<16x128xf32>
    %106 = vector.broadcast %104 : vector<1x128xf32> to vector<16x128xf32>
    %107 = arith.mulf %105, %106 : vector<16x128xf32>
    %108 = arith.addf %102, %107 : vector<16x128xf32>
    %109 = vector.extract_strided_slice %31 {offsets = [0, 12], sizes = [16, 1], strides = [1, 1]} : vector<16x128xf32> to vector<16x1xf32>
    %110 = vector.extract_strided_slice %33 {offsets = [12, 0], sizes = [1, 128], strides = [1, 1]} : vector<24x128xf32> to vector<1x128xf32>
    %111 = vector.broadcast %109 : vector<16x1xf32> to vector<16x128xf32>
    %112 = vector.broadcast %110 : vector<1x128xf32> to vector<16x128xf32>
    %113 = arith.mulf %111, %112 : vector<16x128xf32>
    %114 = arith.addf %108, %113 : vector<16x128xf32>
    %115 = vector.extract_strided_slice %31 {offsets = [0, 13], sizes = [16, 1], strides = [1, 1]} : vector<16x128xf32> to vector<16x1xf32>
    %116 = vector.extract_strided_slice %33 {offsets = [13, 0], sizes = [1, 128], strides = [1, 1]} : vector<24x128xf32> to vector<1x128xf32>
    %117 = vector.broadcast %115 : vector<16x1xf32> to vector<16x128xf32>
    %118 = vector.broadcast %116 : vector<1x128xf32> to vector<16x128xf32>
    %119 = arith.mulf %117, %118 : vector<16x128xf32>
    %120 = arith.addf %114, %119 : vector<16x128xf32>
    %121 = vector.extract_strided_slice %31 {offsets = [0, 14], sizes = [16, 1], strides = [1, 1]} : vector<16x128xf32> to vector<16x1xf32>
    %122 = vector.extract_strided_slice %33 {offsets = [14, 0], sizes = [1, 128], strides = [1, 1]} : vector<24x128xf32> to vector<1x128xf32>
    %123 = vector.broadcast %121 : vector<16x1xf32> to vector<16x128xf32>
    %124 = vector.broadcast %122 : vector<1x128xf32> to vector<16x128xf32>
    %125 = arith.mulf %123, %124 : vector<16x128xf32>
    %126 = arith.addf %120, %125 : vector<16x128xf32>
    %127 = vector.extract_strided_slice %31 {offsets = [0, 15], sizes = [16, 1], strides = [1, 1]} : vector<16x128xf32> to vector<16x1xf32>
    %128 = vector.extract_strided_slice %33 {offsets = [15, 0], sizes = [1, 128], strides = [1, 1]} : vector<24x128xf32> to vector<1x128xf32>
    %129 = vector.broadcast %127 : vector<16x1xf32> to vector<16x128xf32>
    %130 = vector.broadcast %128 : vector<1x128xf32> to vector<16x128xf32>
    %131 = arith.mulf %129, %130 : vector<16x128xf32>
    %132 = arith.addf %126, %131 : vector<16x128xf32>
    %cst_6 = arith.constant 0.000000e+00 : f32
    %133 = vector.broadcast %cst_6 : f32 to vector<16x128xf32>
    %134 = arith.maximumf %132, %133 : vector<16x128xf32>
    %c2 = arith.constant 2 : index
    %c0_7 = arith.constant 0 : index
    %c0_8 = arith.constant 0 : index
    %135 = vector.load %arg1[%c2, %c0_7, %c0_8] : memref<3x24x128xf32, #tpu.memory_space<vmem>>, vector<1x24x128xf32>
    %136 = vector.shape_cast %135 : vector<1x24x128xf32> to vector<24x128xf32>
    %137 = vector.extract_strided_slice %136 {offsets = [16, 0], sizes = [1, 128], strides = [1, 1]} : vector<24x128xf32> to vector<1x128xf32>
    %138 = vector.shape_cast %137 : vector<1x128xf32> to vector<1x128xf32>
    %139 = vector.broadcast %138 : vector<1x128xf32> to vector<16x128xf32>
    %140 = vector.extract_strided_slice %134 {offsets = [0, 0], sizes = [16, 1], strides = [1, 1]} : vector<16x128xf32> to vector<16x1xf32>
    %141 = vector.extract_strided_slice %136 {offsets = [0, 0], sizes = [1, 128], strides = [1, 1]} : vector<24x128xf32> to vector<1x128xf32>
    %142 = vector.broadcast %140 : vector<16x1xf32> to vector<16x128xf32>
    %143 = vector.broadcast %141 : vector<1x128xf32> to vector<16x128xf32>
    %144 = arith.mulf %142, %143 : vector<16x128xf32>
    %145 = arith.addf %139, %144 : vector<16x128xf32>
    %146 = vector.extract_strided_slice %134 {offsets = [0, 1], sizes = [16, 1], strides = [1, 1]} : vector<16x128xf32> to vector<16x1xf32>
    %147 = vector.extract_strided_slice %136 {offsets = [1, 0], sizes = [1, 128], strides = [1, 1]} : vector<24x128xf32> to vector<1x128xf32>
    %148 = vector.broadcast %146 : vector<16x1xf32> to vector<16x128xf32>
    %149 = vector.broadcast %147 : vector<1x128xf32> to vector<16x128xf32>
    %150 = arith.mulf %148, %149 : vector<16x128xf32>
    %151 = arith.addf %145, %150 : vector<16x128xf32>
    %152 = vector.extract_strided_slice %134 {offsets = [0, 2], sizes = [16, 1], strides = [1, 1]} : vector<16x128xf32> to vector<16x1xf32>
    %153 = vector.extract_strided_slice %136 {offsets = [2, 0], sizes = [1, 128], strides = [1, 1]} : vector<24x128xf32> to vector<1x128xf32>
    %154 = vector.broadcast %152 : vector<16x1xf32> to vector<16x128xf32>
    %155 = vector.broadcast %153 : vector<1x128xf32> to vector<16x128xf32>
    %156 = arith.mulf %154, %155 : vector<16x128xf32>
    %157 = arith.addf %151, %156 : vector<16x128xf32>
    %158 = vector.extract_strided_slice %134 {offsets = [0, 3], sizes = [16, 1], strides = [1, 1]} : vector<16x128xf32> to vector<16x1xf32>
    %159 = vector.extract_strided_slice %136 {offsets = [3, 0], sizes = [1, 128], strides = [1, 1]} : vector<24x128xf32> to vector<1x128xf32>
    %160 = vector.broadcast %158 : vector<16x1xf32> to vector<16x128xf32>
    %161 = vector.broadcast %159 : vector<1x128xf32> to vector<16x128xf32>
    %162 = arith.mulf %160, %161 : vector<16x128xf32>
    %163 = arith.addf %157, %162 : vector<16x128xf32>
    %164 = vector.extract_strided_slice %134 {offsets = [0, 4], sizes = [16, 1], strides = [1, 1]} : vector<16x128xf32> to vector<16x1xf32>
    %165 = vector.extract_strided_slice %136 {offsets = [4, 0], sizes = [1, 128], strides = [1, 1]} : vector<24x128xf32> to vector<1x128xf32>
    %166 = vector.broadcast %164 : vector<16x1xf32> to vector<16x128xf32>
    %167 = vector.broadcast %165 : vector<1x128xf32> to vector<16x128xf32>
    %168 = arith.mulf %166, %167 : vector<16x128xf32>
    %169 = arith.addf %163, %168 : vector<16x128xf32>
    %170 = vector.extract_strided_slice %134 {offsets = [0, 5], sizes = [16, 1], strides = [1, 1]} : vector<16x128xf32> to vector<16x1xf32>
    %171 = vector.extract_strided_slice %136 {offsets = [5, 0], sizes = [1, 128], strides = [1, 1]} : vector<24x128xf32> to vector<1x128xf32>
    %172 = vector.broadcast %170 : vector<16x1xf32> to vector<16x128xf32>
    %173 = vector.broadcast %171 : vector<1x128xf32> to vector<16x128xf32>
    %174 = arith.mulf %172, %173 : vector<16x128xf32>
    %175 = arith.addf %169, %174 : vector<16x128xf32>
    %176 = vector.extract_strided_slice %134 {offsets = [0, 6], sizes = [16, 1], strides = [1, 1]} : vector<16x128xf32> to vector<16x1xf32>
    %177 = vector.extract_strided_slice %136 {offsets = [6, 0], sizes = [1, 128], strides = [1, 1]} : vector<24x128xf32> to vector<1x128xf32>
    %178 = vector.broadcast %176 : vector<16x1xf32> to vector<16x128xf32>
    %179 = vector.broadcast %177 : vector<1x128xf32> to vector<16x128xf32>
    %180 = arith.mulf %178, %179 : vector<16x128xf32>
    %181 = arith.addf %175, %180 : vector<16x128xf32>
    %182 = vector.extract_strided_slice %134 {offsets = [0, 7], sizes = [16, 1], strides = [1, 1]} : vector<16x128xf32> to vector<16x1xf32>
    %183 = vector.extract_strided_slice %136 {offsets = [7, 0], sizes = [1, 128], strides = [1, 1]} : vector<24x128xf32> to vector<1x128xf32>
    %184 = vector.broadcast %182 : vector<16x1xf32> to vector<16x128xf32>
    %185 = vector.broadcast %183 : vector<1x128xf32> to vector<16x128xf32>
    %186 = arith.mulf %184, %185 : vector<16x128xf32>
    %187 = arith.addf %181, %186 : vector<16x128xf32>
    %188 = vector.extract_strided_slice %187 {offsets = [0, 0], sizes = [16, 3], strides = [1, 1]} : vector<16x128xf32> to vector<16x3xf32>
    %c0_9 = arith.constant 0 : index
    %c0_10 = arith.constant 0 : index
    %189 = vector.load %arg3[%c0_9, %c0_10] : memref<16x3xf32, #tpu.memory_space<vmem>>, vector<16x3xf32>
    tpu.vector_store %arg3[%c0_9, %c0_10], %188 {strides = array<i32>} : memref<16x3xf32, #tpu.memory_space<vmem>>, vector<16x3xf32>,
    return
  }
  func.func @transform_0(%arg0: i32) -> (i32, i32, i32) {
    %c0_i32 = arith.constant 0 : i32
    %c0_i32_0 = arith.constant 0 : i32
    %c0_i32_1 = arith.constant 0 : i32
    %c0_i32_2 = arith.constant 0 : i32
    return %c0_i32, %c0_i32_0, %c0_i32_1 : i32, i32, i32
  }
  func.func @transform_1(%arg0: i32) -> (i32, i32) {
    %c0_i32 = arith.constant 0 : i32
    %c0_i32_0 = arith.constant 0 : i32
    return %arg0, %c0_i32 : i32, i32
  }
  func.func @transform_2(%arg0: i32) -> (i32, i32) {
    %c0_i32 = arith.constant 0 : i32
    %c0_i32_0 = arith.constant 0 : i32
    return %arg0, %c0_i32 : i32, i32
  }
}

</mosaic_0001>

<bundles_post_ra>
// kernel: tpu_custom_call.1
= control target key start
LH: loop header
LB: loop body
LE: loop exit
PB: predicated region body
PF: predicated region fallthrough
CT: control target
= control target key end

     0   :  { %7 = vsyncpa [#allocation3], 0  ;;  %s884_s9 = smov 0   ;;  %s1076_s0 = inlined_call_operand.hbm [shape: f32[3,24,128], index: 0, kind: input, shape index: {}]   ;;  %s1077_s1 = inlined_call_operand.vmem [shape: f32[32,4], index: 1, kind: input, shape index: {}]   ;;  %s1078_s2 = inlined_call_operand.vmem [shape: f32[32,3], index: 2, kind: output, shape index: {}]  }
   0x1 LB: > { %s714_s10 = sadd.s32 4294967295, %s848_s9   ;;  %p716_p0 = scmp.ge.s32.totalorder %s848_s9, 1  ;;  %s848_s9 = sphi %s884_s9, %s13_s9  }
   0x2   : > { %p91_p1 = scmp.lt.s32.totalorder %s848_s9, 3  ;;  %s850_s11 = smov [#allocation2]  }
   0x3   : > { %s103_s12 = sshll.u32 %s850_s11, 4  ;;  %p898_p3 = scmp.eq.s32.totalorder %s714_s10, 0  ;;  %s104_s12 = int_to_ptr.vmem [resolvable:$true] %s103_s12 }
   0x4   : > { %p892_p2 = pnand %p716_p0, %p91_p1  ;;  %s810_s18 = scalar_lea.hbm %s1076_s0, 1152 }
   0x5   : > { %s1083_s14 = scalar_select %p898_p3, 1, 0 }
   0x6   : > { %s1082_s13 = scalar_select %p892_p2, 1, 0 }
   0x7   : > { %p731_p4 = pneg %p892_p2  ;;  %p811_p6 = scmp.ne.s32.totalorder %s1076_s0, %s810_s18 }
   0x8   : > { %p817_p10 = scmp.lt.u32.totalorder %s810_s18, %s1076_s0 }
   0x9   : > { %p906_p5 = pnand %p898_p3, %p731_p4 }
   0xb   : > { %p812_p7 = pneg %p906_p5 }
   0xd   : > { %p813_p8 = pnand %p812_p7, %p811_p6 }
   0xf   : > { %p814_p9 = pneg %p813_p8 }
  0x11   : > { %p819_p11 = pnand %p817_p10, %p814_p9 }
  0x13   : > { %822 = shalt.err (!%p819_p11)
}
  0x14   : > { %s823_s23 = scalar_lea.vmem %s104_s12, 1152  ;;  %p831_p1 = scmp.lt.s32.totalorder %s104_s12, %s104_s12 }
  0x15   : > { %p824_p12 = scmp.ne.s32.totalorder %s104_s12, %s823_s23  ;;  %p832_p4 = scmp.lt.s32.totalorder %s823_s23, %s823_s23 }
  0x17   : > { %p826_p13 = pnand %p824_p12, %p812_p7  ;;  %p833_p3 = por %p832_p4, %p831_p1 }
  0x19   : > { %p827_p0 = pneg %p826_p13 }
  0x1b   : > { %p834_p2 = pnand %p833_p3, %p827_p0 }
  0x1d   : > { %837 = shalt.err (!%p834_p2)
}
  0x1e   : > { %s851_s24 = smov 128   ;;  %s852_s25 = smov 8  }
  0x1f   : > { %734 = dma.hbm_to_vmem [thread:$0]  (!%p906_p5), %s1076_s0, 1152, %s104_s12, [#allocation3], %s851_s24, %s851_s24, %s852_s25  }
  0x20   : > { %p1085_p6 = scmp.ne.s32.totalorder %s1082_s13, 0 }
  0x21   : > { %p1086_p8 = scmp.ne.s32.totalorder (!%p1085_p6), %s1083_s14, 0 }
  0x22   : > { %128 = sbr.rel (%p1085_p6) target bundleno = 606 (0x25e), region = 28 }
  0x29   : > { %843 = dma.done.wait (%p1086_p8), [#allocation3], 1152  }
  0x2a   : > { %845 = vsyncadd (%p1086_p8), [#allocation3], 4294966144  ;;  %s721_s28 = sshll.u32 %s714_s10, 1  ;;  %v853_v0 = vmov 1   ;;  %v854_v1 = vmov 0   ;;  %v855_v4 = vmov 2   ;;  %v166_v6 = vlaneseq }
  0x2b   : > { %765 = vset.pattern.permute.xlu1 %v853_v0  ;;  %764 = vset.pattern.permute.xlu0 %v854_v1  ;;  %p151_p2 = scmp.lt.s32.totalorder %s721_s28, 3  ;;  %v856_v5 = vmov 3   ;;  %v164_v9 = vld [vmem:[#allocation2] sm:$0xff]  ;;  %v165_v13 = vld [vmem:[#allocation2 + $0x10] sm:$0xff]  ;;  %v857_v45 = vmov 4   ;;  %v858_v46 = vmov 5  }
  0x2c   : > { %v950_v7 = vshrl.u32 %v166_v6, 7  ;;  %v859_v47 = vmov 7   ;;  %v860_v48 = vmov 8   ;;  %v861_v49 = vmov 10  }
  0x2d   : > { %s1088_s28 = smov (!%p151_p2, %s721_s28), 3  ;;  %v862_v50 = vmov 11   ;;  %v863_v51 = vmov 6   ;;  %v864_v52 = vmov 13   ;;  %v865_v53 = vmov 14  }
  0x2e   : > { %s722_s29 = sshll.u32 %s1088_s28, 3  ;;  %v953_v8 = vsub.s32 0, %v950_v7  ;;  %v957_v14 = vsub.s32 1, %v950_v7  ;;  %v960_v15 = vsub.s32 2, %v950_v7  ;;  %v966_v23 = vsub.s32 3, %v950_v7 }
  0x2f   : > { %s154_s4 = scalar_lea.vmem %s1077_s1, %s722_s29  ;;  %v866_v54 = vmov 9   ;;  %v867_v55 = vmov 12   ;;  %v868_v56 = vmov 15   ;;  %s160_s7 = scalar_lea.vmem %s1078_s2, %s722_s29  ;;  %vm643_vm0 = vcmask 23552  }
  0x30   : > { %v162_v2 = vld [vmem:[%s154_s4] sm:$0xff]  ;;  %v163_v3 = vld [vmem:[%s154_s4 + $0x8] sm:$0xff]  ;;  %v183_v12 = vrot.slane %v164_v9, %v953_v8  ;;  %v169_v18 = vrot.slane %v165_v13, %v953_v8  ;;  %v199_v21 = vrot.slane %v164_v9, %v957_v14  ;;  %v215_v22 = vrot.slane %v164_v9, %v960_v15 }
  0x31   : > { %189 = vperm.xlu1 %765, %v162_v2   ;;  %172 = vperm.xlu0 %764, %v162_v2   ;;  %v231_v31 = vrot.slane %v164_v9, %v966_v23 }
  0x35   : > { %193 = vperm.xlu1 %765, %v163_v3   ;;  %177 = vperm.xlu0 %764, %v163_v3  }
  0x39   : > { %767 = vset.pattern.permute.xlu1 %v855_v4  ;;  %766 = vset.pattern.permute.xlu0 %v855_v4 }
  0x3a   : > { %209 = vperm.xlu1 %767, %v163_v3   ;;  %205 = vperm.xlu0 %766, %v162_v2  }
  0x3e   : > { %768 = vset.pattern.permute.xlu1 %v856_v5  ;;  %769 = vset.pattern.permute.xlu0 %v856_v5 }
  0x3f   : > { %221 = vperm.xlu1 %768, %v162_v2   ;;  %225 = vperm.xlu0 %769, %v163_v3  }
  0x43   : > { %770 = vset.pattern.permute.xlu1 %v854_v1  ;;  %771 = vset.pattern.permute.xlu0 %v853_v0 }
  0xb0   : > { %v190_v10 = vpop.permute.xlu1 %189  ;;  %v173_v11 = vpop.permute.xlu0 %172 }
  0xb1   : > { %v184_v19 = vmul.f32 %v183_v12, %v173_v11  ;;  %v200_v28 = vmul.f32 %v199_v21, %v190_v10  ;;  %v239_v10 = vld [vmem:[#allocation2 + $0x18] sm:$0xff] }
  0xb2   : > { %v259_v13 = vrot.slane %v239_v10, %v953_v8 }
  0xb3   : > { %v186_v24 = vadd.f32 %v184_v19, %v169_v18 }
  0xb4   : > { %v194_v16 = vpop.permute.xlu1 %193  ;;  %v178_v17 = vpop.permute.xlu0 %177 }
  0xb5   : > { %v185_v20 = vmul.f32 %v183_v12, %v178_v17  ;;  %v201_v29 = vmul.f32 %v199_v21, %v194_v16  ;;  %v202_v34 = vadd.f32 %v200_v28, %v186_v24  ;;  %v241_v16 = vld [vmem:[#allocation2 + $0x28] sm:$0xff] }
  0xb7   : > { %v187_v25 = vadd.f32 %v185_v20, %v169_v18  ;;  %v275_v20 = vrot.slane %v239_v10, %v957_v14 }
  0xb9   : > { %v210_v26 = vpop.permute.xlu1 %209  ;;  %v206_v27 = vpop.permute.xlu0 %205  ;;  %v203_v32 = vadd.f32 %v201_v29, %v187_v25  ;;  %v291_v25 = vrot.slane %v239_v10, %v960_v15 }
  0xba   : > { %v216_v30 = vmul.f32 %v215_v22, %v206_v27  ;;  %v217_v33 = vmul.f32 %v215_v22, %v210_v26  ;;  %v307_v26 = vrot.slane %v239_v10, %v966_v23 }
  0xbc   : > { %v218_v37 = vadd.f32 %v216_v30, %v202_v34  ;;  %v219_v40 = vadd.f32 %v217_v33, %v203_v32  ;;  %v1024_v30 = vsub.s32 4, %v950_v7  ;;  %v1027_v32 = vsub.s32 5, %v950_v7 }
  0xbe   : > { %v222_v35 = vpop.permute.xlu1 %221  ;;  %v226_v36 = vpop.permute.xlu0 %225 }
  0xbf   : > { %v232_v38 = vmul.f32 %v231_v31, %v222_v35  ;;  %v233_v39 = vmul.f32 %v231_v31, %v226_v36 }
  0xc1   : > { %v234_v41 = vadd.f32 %v232_v38, %v218_v37  ;;  %v235_v43 = vadd.f32 %v233_v39, %v219_v40  ;;  %v1030_v37 = vsub.s32 6, %v950_v7  ;;  %v323_v39 = vrot.slane %v239_v10, %v1024_v30 }
  0xc3   : > { %v969_v42 = vmax.f32 %v234_v41, 0.0  ;;  %v973_v44 = vmax.f32 %v235_v43, 0.0  ;;  %v339_v41 = vrot.slane %v239_v10, %v1027_v32 }
  0xc5   : > { %265 = vperm.xlu0 %771, %v969_v42   ;;  %248 = vperm.xlu1 %770, %v969_v42  }
  0xc9   : > { %774 = vset.pattern.permute.xlu0 %v855_v4  ;;  %253 = vperm.xlu1 %770, %v973_v44  }
  0xca   : > { %285 = vperm.xlu0 %774, %v973_v44  }
  0xcd   : > { %772 = vset.pattern.permute.xlu1 %v853_v0 }
  0xce   : > { %776 = vset.pattern.permute.xlu0 %v857_v45  ;;  %269 = vperm.xlu1 %772, %v973_v44  }
  0xcf   : > { %313 = vperm.xlu0 %776, %v969_v42  }
  0xd2   : > { %773 = vset.pattern.permute.xlu1 %v855_v4 }
  0xd3   : > { %779 = vset.pattern.permute.xlu0 %v858_v46  ;;  %281 = vperm.xlu1 %773, %v969_v42  }
  0xd4   : > { %333 = vperm.xlu0 %779, %v973_v44  }
  0xd7   : > { %775 = vset.pattern.permute.xlu1 %v856_v5 }
  0xd8   : > { %781 = vset.pattern.permute.xlu0 %v859_v47  ;;  %297 = vperm.xlu1 %775, %v969_v42  }
  0xd9   : > { %361 = vperm.xlu0 %781, %v969_v42  }
  0xdc   : > { %301 = vperm.xlu1 %775, %v973_v44  }
  0xdd   : > { %784 = vset.pattern.permute.xlu0 %v860_v48 }
  0xde   : > { %381 = vperm.xlu0 %784, %v973_v44  }
  0xe0   : > { %777 = vset.pattern.permute.xlu1 %v857_v45 }
  0xe1   : > { %317 = vperm.xlu1 %777, %v973_v44  }
  0xe2   : > { %786 = vset.pattern.permute.xlu0 %v861_v49 }
  0xe3   : > { %409 = vperm.xlu0 %786, %v969_v42  }
  0xe5   : > { %778 = vset.pattern.permute.xlu1 %v858_v46 }
  0xe6   : > { %329 = vperm.xlu1 %778, %v969_v42  }
  0xe7   : > { %789 = vset.pattern.permute.xlu0 %v862_v50 }
  0xe8   : > { %429 = vperm.xlu0 %789, %v973_v44  }
  0xea   : > { %780 = vset.pattern.permute.xlu1 %v863_v51 }
  0xeb   : > { %345 = vperm.xlu1 %780, %v969_v42  }
  0xec   : > { %791 = vset.pattern.permute.xlu0 %v864_v52 }
  0xed   : > { %457 = vperm.xlu0 %791, %v969_v42  }
  0xef   : > { %349 = vperm.xlu1 %780, %v973_v44  }
  0xf1   : > { %794 = vset.pattern.permute.xlu0 %v865_v53 }
  0xf2   : > { %477 = vperm.xlu0 %794, %v973_v44  }
  0xf3   : > { %782 = vset.pattern.permute.xlu1 %v859_v47 }
  0xf4   : > { %365 = vperm.xlu1 %782, %v973_v44  }
  0xf6   : > { %796 = vset.pattern.permute.xlu0 %v854_v1 }
  0xf8   : > { %783 = vset.pattern.permute.xlu1 %v860_v48 }
  0xf9   : > { %377 = vperm.xlu1 %783, %v969_v42  }
  0xfd   : > { %785 = vset.pattern.permute.xlu1 %v866_v54 }
  0xfe   : > { %393 = vperm.xlu1 %785, %v969_v42  }
 0x102   : > { %397 = vperm.xlu1 %785, %v973_v44  }
 0x106   : > { %787 = vset.pattern.permute.xlu1 %v861_v49  ;;  %v355_v49 = vrot.slane %v239_v10, %v1030_v37 }
 0x107   : > { %413 = vperm.xlu1 %787, %v973_v44  }
 0x10b   : > { %788 = vset.pattern.permute.xlu1 %v862_v50 }
 0x10c   : > { %425 = vperm.xlu1 %788, %v969_v42  }
 0x110   : > { %790 = vset.pattern.permute.xlu1 %v867_v55 }
 0x111   : > { %441 = vperm.xlu1 %790, %v969_v42  }
 0x115   : > { %445 = vperm.xlu1 %790, %v973_v44  }
 0x119   : > { %792 = vset.pattern.permute.xlu1 %v864_v52  ;;  %v1036_v52 = vsub.s32 7, %v950_v7 }
 0x11a   : > { %461 = vperm.xlu1 %792, %v973_v44  }
 0x11e   : > { %793 = vset.pattern.permute.xlu1 %v865_v53 }
 0x11f   : > { %473 = vperm.xlu1 %793, %v969_v42  }
 0x123   : > { %795 = vset.pattern.permute.xlu1 %v868_v56 }
 0x124   : > { %489 = vperm.xlu1 %795, %v969_v42  }
 0x128   : > { %493 = vperm.xlu1 %795, %v973_v44  }
 0x12c   : > { %797 = vset.pattern.permute.xlu1 %v854_v1  ;;  %v245_v1 = vrot.slane %v241_v16, %v953_v8 }
 0x144   : > { %v249_v57 = vpop.permute.xlu1 %248  ;;  %v266_v6 = vpop.permute.xlu0 %265 }
 0x145   : > { %v260_v19 = vmul.f32 %v259_v13, %v249_v57  ;;  %v276_v28 = vmul.f32 %v275_v20, %v266_v6 }
 0x147   : > { %v262_v22 = vadd.f32 %v260_v19, %v245_v1 }
 0x148   : > { %v254_v58 = vpop.permute.xlu1 %253 }
 0x149   : > { %v286_v11 = vpop.permute.xlu0 %285  ;;  %v261_v24 = vmul.f32 %v259_v13, %v254_v58  ;;  %v278_v34 = vadd.f32 %v276_v28, %v262_v22  ;;  %v240_v58 = vld [vmem:[#allocation2 + $0x20] sm:$0xff] }
 0x14a   : > { %v293_v43 = vmul.f32 %v291_v25, %v286_v11  ;;  %v371_v11 = vrot.slane %v239_v10, %v1036_v52  ;;  %v387_v16 = vrot.slane %v240_v58, %v953_v8  ;;  %v419_v10 = vrot.slane %v240_v58, %v960_v15 }
 0x14b   : > { %v263_v35 = vadd.f32 %v261_v24, %v245_v1 }
 0x14d   : > { %v270_v59 = vpop.permute.xlu1 %269 }
 0x14e   : > { %v314_v18 = vpop.permute.xlu0 %313  ;;  %v277_v29 = vmul.f32 %v275_v20, %v270_v59 }
 0x14f   : > { %v324_v53 = vmul.f32 %v323_v39, %v314_v18  ;;  %v403_v18 = vrot.slane %v240_v58, %v957_v14 }
 0x150   : > { %v279_v38 = vadd.f32 %v277_v29, %v263_v35 }
 0x152   : > { %v282_v60 = vpop.permute.xlu1 %281  ;;  %v295_v54 = vadd.f32 %v293_v43, %v279_v38  ;;  %v451_v38 = vrot.slane %v240_v58, %v1024_v30 }
 0x153   : > { %v334_v27 = vpop.permute.xlu0 %333  ;;  %v292_v31 = vmul.f32 %v291_v25, %v282_v60 }
 0x154   : > { %v341_v1 = vmul.f32 %v339_v41, %v334_v27  ;;  %v435_v27 = vrot.slane %v240_v58, %v966_v23 }
 0x155   : > { %v294_v40 = vadd.f32 %v292_v31, %v278_v34 }
 0x157   : > { %v298_v61 = vpop.permute.xlu1 %297 }
 0x158   : > { %v308_v36 = vmul.f32 %v307_v26, %v298_v61  ;;  %v362_v42 = vpop.permute.xlu0 %361 }
 0x159   : > { %v372_v20 = vmul.f32 %v371_v11, %v362_v42 }
 0x15a   : > { %v310_v44 = vadd.f32 %v308_v36, %v294_v40 }
 0x15b   : > { %v302_v62 = vpop.permute.xlu1 %301 }
 0x15c   : > { %v309_v48 = vmul.f32 %v307_v26, %v302_v62  ;;  %v326_v59 = vadd.f32 %v324_v53, %v310_v44 }
 0x15d   : > { %v382_v61 = vpop.permute.xlu0 %381 }
 0x15e   : > { %v311_v57 = vadd.f32 %v309_v48, %v295_v54  ;;  %v389_v35 = vmul.f32 %v387_v16, %v382_v61  ;;  %v467_v48 = vrot.slane %v240_v58, %v1027_v32 }
 0x160   : > { %v318_v63 = vpop.permute.xlu1 %317 }
 0x161   : > { %v325_v55 = vmul.f32 %v323_v39, %v318_v63 }
 0x162   : > { %v410_v25 = vpop.permute.xlu0 %409 }
 0x163   : > { %v327_v13 = vadd.f32 %v325_v55, %v311_v57 }
 0x165   : > { %v330_v2 = vpop.permute.xlu1 %329  ;;  %v343_v63 = vadd.f32 %v341_v1, %v327_v13 }
 0x166   : > { %v340_v56 = vmul.f32 %v339_v41, %v330_v2 }
 0x167   : > { %v430_v39 = vpop.permute.xlu0 %429 }
 0x168   : > { %v342_v62 = vadd.f32 %v340_v56, %v326_v59  ;;  %v437_v55 = vmul.f32 %v435_v27, %v430_v39  ;;  %v483_v56 = vrot.slane %v240_v58, %v1030_v37 }
 0x16a   : > { %v346_v3 = vpop.permute.xlu1 %345 }
 0x16b   : > { %v356_v60 = vmul.f32 %v355_v49, %v346_v3 }
 0x16c   : > { %v458_v54 = vpop.permute.xlu0 %457 }
 0x16d   : > { %v358_v19 = vadd.f32 %v356_v60, %v342_v62  ;;  %v499_v60 = vrot.slane %v240_v58, %v1036_v52  ;;  %v468_v61 = vmul.f32 %v467_v48, %v458_v54 }
 0x16e   : > { %v350_v9 = vpop.permute.xlu1 %349 }
 0x16f   : > { %v357_v7 = vmul.f32 %v355_v49, %v350_v9  ;;  %v374_v26 = vadd.f32 %v372_v20, %v358_v19 }
 0x171   : > { %v359_v3 = vadd.f32 %v357_v7, %v343_v63 }
 0x173   : > { %v366_v12 = vpop.permute.xlu1 %365 }
 0x174   : > { %v373_v2 = vmul.f32 %v371_v11, %v366_v12  ;;  %v420_v12 = vmul.f32 %v419_v10, %v410_v25 }
 0x176   : > { %v375_v29 = vadd.f32 %v373_v2, %v359_v3 }
 0x178   : > { %v378_v17 = vpop.permute.xlu1 %377 }
 0x179   : > { %v388_v22 = vmul.f32 %v387_v16, %v378_v17  ;;  %v391_v17 = vadd.f32 %v389_v35, %v375_v29  ;;  %v478_v16 = vpop.permute.xlu0 %477 }
 0x17a   : > { %v485_v20 = vmul.f32 %v483_v56, %v478_v16 }
 0x17b   : > { %v390_v31 = vadd.f32 %v388_v22, %v374_v26 }
 0x17d   : > { %v394_v21 = vpop.permute.xlu1 %393 }
 0x17e   : > { %v404_v28 = vmul.f32 %v403_v18, %v394_v21 }
 0x180   : > { %v406_v9 = vadd.f32 %v404_v28, %v390_v31 }
 0x181   : > { %v398_v33 = vpop.permute.xlu1 %397 }
 0x182   : > { %v405_v36 = vmul.f32 %v403_v18, %v398_v33  ;;  %v422_v21 = vadd.f32 %v420_v12, %v406_v9 }
 0x184   : > { %v407_v43 = vadd.f32 %v405_v36, %v391_v17 }
 0x186   : > { %v414_v50 = vpop.permute.xlu1 %413 }
 0x187   : > { %v421_v40 = vmul.f32 %v419_v10, %v414_v50  ;;  %v507_v10 = vld [vmem:[#allocation2 + $0x30] sm:$0xff] }
 0x189   : > { %v423_v49 = vadd.f32 %v421_v40, %v407_v43 }
 0x18b   : > { %v426_v6 = vpop.permute.xlu1 %425  ;;  %v439_v50 = vadd.f32 %v437_v55, %v423_v49 }
 0x18c   : > { %v436_v41 = vmul.f32 %v435_v27, %v426_v6  ;;  %v542_v27 = vrot.slane %v507_v10, %v957_v14 }
 0x18e   : > { %v438_v53 = vadd.f32 %v436_v41, %v422_v21  ;;  %v574_v41 = vrot.slane %v507_v10, %v966_v23 }
 0x190   : > { %v442_v24 = vpop.permute.xlu1 %441 }
 0x191   : > { %v452_v44 = vmul.f32 %v451_v38, %v442_v24 }
 0x193   : > { %v454_v33 = vadd.f32 %v452_v44, %v438_v53  ;;  %v606_v53 = vrot.slane %v507_v10, %v1027_v32  ;;  %v638_v32 = vrot.slane %v507_v10, %v1036_v52 }
 0x194   : > { %v446_v34 = vpop.permute.xlu1 %445 }
 0x195   : > { %v453_v57 = vmul.f32 %v451_v38, %v446_v34  ;;  %v470_v62 = vadd.f32 %v468_v61, %v454_v33  ;;  %v508_v34 = vld [vmem:[#allocation2 + $0x40] sm:$0xff]  ;;  %v622_v61 = vrot.slane %v507_v10, %v1030_v37 }
 0x197   : > { %v455_v13 = vadd.f32 %v453_v57, %v439_v50 }
 0x199   : > { %v462_v42 = vpop.permute.xlu1 %461 }
 0x19a   : > { %v469_v6 = vmul.f32 %v467_v48, %v462_v42 }
 0x19c   : > { %v471_v19 = vadd.f32 %v469_v6, %v455_v13 }
 0x19e   : > { %v474_v59 = vpop.permute.xlu1 %473  ;;  %v487_v24 = vadd.f32 %v485_v20, %v471_v19 }
 0x19f   : > { %v484_v11 = vmul.f32 %v483_v56, %v474_v59 }
 0x1a1   : > { %v486_v7 = vadd.f32 %v484_v11, %v470_v62 }
 0x1a3   : > { %v490_v1 = vpop.permute.xlu1 %489 }
 0x1a4   : > { %v500_v18 = vmul.f32 %v499_v60, %v490_v1 }
 0x1a6   : > { %v502_v63 = vadd.f32 %v500_v18, %v486_v7 }
 0x1a7   : > { %v494_v2 = vpop.permute.xlu1 %493 }
 0x1a8   : > { %v504_v22 = vmax.f32 %v502_v63, 0.0  ;;  %v501_v25 = vmul.f32 %v499_v60, %v494_v2 }
 0x1aa   : > { %v503_v3 = vadd.f32 %v501_v25, %v487_v24  ;;  %515 = vperm.xlu0 %796, %v504_v22  }
 0x1ac   : > { %v505_v58 = vmax.f32 %v503_v3, 0.0 }
 0x1ae   : > { %799 = vset.pattern.permute.xlu0 %v853_v0  ;;  %520 = vperm.xlu1 %797, %v505_v58  }
 0x1af   : > { %536 = vperm.xlu0 %799, %v505_v58  }
 0x1b2   : > { %798 = vset.pattern.permute.xlu1 %v853_v0 }
 0x1b3   : > { %801 = vset.pattern.permute.xlu0 %v856_v5  ;;  %532 = vperm.xlu1 %798, %v504_v22  }
 0x1b4   : > { %564 = vperm.xlu0 %801, %v504_v22  }
 0x1b7   : > { %800 = vset.pattern.permute.xlu1 %v855_v4 }
 0x1b8   : > { %804 = vset.pattern.permute.xlu0 %v857_v45  ;;  %548 = vperm.xlu1 %800, %v504_v22  }
 0x1b9   : > { %584 = vperm.xlu0 %804, %v505_v58  }
 0x1bc   : > { %552 = vperm.xlu1 %800, %v505_v58  }
 0x1bd   : > { %806 = vset.pattern.permute.xlu0 %v863_v51 }
 0x1be   : > { %612 = vperm.xlu0 %806, %v504_v22  }
 0x1c0   : > { %802 = vset.pattern.permute.xlu1 %v856_v5 }
 0x1c1   : > { %568 = vperm.xlu1 %802, %v505_v58  }
 0x1c2   : > { %809 = vset.pattern.permute.xlu0 %v859_v47 }
 0x1c3   : > { %632 = vperm.xlu0 %809, %v505_v58  }
 0x1c5   : > { %803 = vset.pattern.permute.xlu1 %v857_v45  ;;  %v526_v45 = vrot.slane %v507_v10, %v953_v8 }
 0x1c6   : > { %580 = vperm.xlu1 %803, %v504_v22  }
 0x1ca   : > { %805 = vset.pattern.permute.xlu1 %v858_v46 }
 0x1cb   : > { %596 = vperm.xlu1 %805, %v504_v22  }
 0x1cf   : > { %600 = vperm.xlu1 %805, %v505_v58  }
 0x1d3   : > { %807 = vset.pattern.permute.xlu1 %v863_v51  ;;  %v512_v51 = vrot.slane %v508_v34, %v953_v8  ;;  %v590_v8 = vrot.slane %v507_v10, %v1024_v30 }
 0x1d4   : > { %616 = vperm.xlu1 %807, %v505_v58  }
 0x1d8   : > { %808 = vset.pattern.permute.xlu1 %v859_v47  ;;  %v558_v47 = vrot.slane %v507_v10, %v960_v15 }
 0x1d9   : > { %628 = vperm.xlu1 %808, %v504_v22  }
 0x229   : > { %v516_v26 = vpop.permute.xlu0 %515 }
 0x22a   : > { %v527_v35 = vmul.f32 %v526_v45, %v516_v26 }
 0x22c   : > { %v529_v17 = vadd.f32 %v527_v35, %v512_v51 }
 0x22d   : > { %v521_v0 = vpop.permute.xlu1 %520 }
 0x22e   : > { %v537_v29 = vpop.permute.xlu0 %536  ;;  %v528_v46 = vmul.f32 %v526_v45, %v521_v0 }
 0x22f   : > { %v544_v12 = vmul.f32 %v542_v27, %v537_v29 }
 0x230   : > { %v530_v39 = vadd.f32 %v528_v46, %v512_v51 }
 0x232   : > { %v533_v4 = vpop.permute.xlu1 %532  ;;  %v546_v48 = vadd.f32 %v544_v12, %v530_v39 }
 0x233   : > { %v565_v9 = vpop.permute.xlu0 %564  ;;  %v543_v38 = vmul.f32 %v542_v27, %v533_v4 }
 0x234   : > { %v575_v55 = vmul.f32 %v574_v41, %v565_v9 }
 0x235   : > { %v545_v21 = vadd.f32 %v543_v38, %v529_v17 }
 0x237   : > { %v549_v5 = vpop.permute.xlu1 %548 }
 0x238   : > { %v559_v40 = vmul.f32 %v558_v47, %v549_v5  ;;  %v585_v44 = vpop.permute.xlu0 %584 }
 0x239   : > { %v592_v23 = vmul.f32 %v590_v8, %v585_v44 }
 0x23a   : > { %v561_v49 = vadd.f32 %v559_v40, %v545_v21 }
 0x23b   : > { %v553_v28 = vpop.permute.xlu1 %552 }
 0x23c   : > { %v560_v42 = vmul.f32 %v558_v47, %v553_v28  ;;  %v577_v59 = vadd.f32 %v575_v55, %v561_v49 }
 0x23d   : > { %v613_v57 = vpop.permute.xlu0 %612 }
 0x23e   : > { %v562_v15 = vadd.f32 %v560_v42, %v546_v48  ;;  %v623_v1 = vmul.f32 %v622_v61, %v613_v57 }
 0x240   : > { %v569_v31 = vpop.permute.xlu1 %568 }
 0x241   : > { %v576_v14 = vmul.f32 %v574_v41, %v569_v31 }
 0x242   : > { %v633_v19 = vpop.permute.xlu0 %632 }
 0x243   : > { %v578_v33 = vadd.f32 %v576_v14, %v562_v15  ;;  %v640_v37 = vmul.f32 %v638_v32, %v633_v19 }
 0x245   : > { %v581_v36 = vpop.permute.xlu1 %580  ;;  %v594_v13 = vadd.f32 %v592_v23, %v578_v33 }
 0x246   : > { %v591_v56 = vmul.f32 %v590_v8, %v581_v36 }
 0x248   : > { %v593_v6 = vadd.f32 %v591_v56, %v577_v59 }
 0x24a   : > { %v597_v43 = vpop.permute.xlu1 %596 }
 0x24b   : > { %v607_v60 = vmul.f32 %v606_v53, %v597_v43 }
 0x24d   : > { %v609_v30 = vadd.f32 %v607_v60, %v593_v6 }
 0x24e   : > { %v601_v54 = vpop.permute.xlu1 %600 }
 0x24f   : > { %v608_v50 = vmul.f32 %v606_v53, %v601_v54  ;;  %v625_v20 = vadd.f32 %v623_v1, %v609_v30 }
 0x251   : > { %v610_v16 = vadd.f32 %v608_v50, %v594_v13 }
 0x253   : > { %v617_v11 = vpop.permute.xlu1 %616 }
 0x254   : > { %v624_v62 = vmul.f32 %v622_v61, %v617_v11 }
 0x256   : > { %v626_v7 = vadd.f32 %v624_v62, %v610_v16 }
 0x258   : > { %v629_v18 = vpop.permute.xlu1 %628  ;;  %v642_v22 = vadd.f32 %v640_v37, %v626_v7 }
 0x259   : > { %v639_v63 = vmul.f32 %v638_v32, %v629_v18 }
 0x25a   : > { %645 = vst.msk [vmem:[%s160_s7 + $0x8] sm:$0xff] %vm643_vm0, %v642_v22 }
 0x25b   : > { %v641_v2 = vadd.f32 %v639_v63, %v625_v20 }
 0x25d   : > { %644 = vst.msk [vmem:[%s160_s7] sm:$0xff] %vm643_vm0, %v641_v2 }
 0x25e PF: > { %s13_s9 = sadd.s32 1, %s848_s9  }
 0x25f   : > { %p10_p3 = scmp.ge.s32.totalorder %s13_s9, 4  }
 0x261   :  { %12 = sbr.rel (!%p10_p3) target bundleno = 1 (0x1), region = 65 }
 0x268   :  { %668 = vsyncpa [#allocation3], 1 }
 0x269   :  { %670 = vsyncpa [#allocation3 + $0x1], 1 }

</bundles_post_ra>
